<compile_context>
chip_gen: v7x
topology: tpu7x:2x2x1
jax: 0.10.0
libtpu: 0.0.40
codegen_flags: <defaults>
</compile_context>

<pallas_src>
import math
from functools import partial

import jax
import jax.numpy as jnp
from jax import lax
from jax.experimental import pallas as pl
from jax.experimental.pallas import tpu as pltpu


# contract the LAST dim of both operands (x @ W.T without a transpose op)
_CONTRACT_LAST = (((1,), (1,)), ((), ()))
# standard matmul: last dim of lhs with first dim of rhs
_CONTRACT_STD = (((1,), (0,)), ((), ()))


# --------------------------------------------------------------------------- #
# helpers: hardware-aware tiling / VMEM budgeting
# --------------------------------------------------------------------------- #
def _round_up(n, m):
    return ((n + m - 1) // m) * m


def _sublane_multiple(dtype):
    # minimum second-minor tile: 8 rows for 4-byte, 16 for 2-byte, 32 for 1-byte dtypes
    return max(8, 32 // jnp.dtype(dtype).itemsize)


def _vmem_capacity_bytes():
    try:
        cap = getattr(pltpu.get_tpu_info(), "vmem_capacity_bytes", None)
        if cap:
            return int(cap)
    except Exception:
        pass
    return 128 * 1024 * 1024  # v5e/v6e default; v7x reports its 64 MiB via get_tpu_info


def _flash_vmem_bytes(tile, D, H, d_k, esize):
    lane_dk = _round_up(d_k, 128)
    lane_D = _round_up(D, 128)
    return (2 * 3 * H * tile * lane_dk * esize        # Q/K/V blocks (double-buffered)
            + 2 * tile * lane_D * esize               # output block (double-buffered)
            + H * _round_up(d_k, 8) * lane_D * esize  # Wo (single-buffered)
            + H * tile * lane_dk * 4                  # f32 context accumulator scratch
            + 3 * H * tile * 128 * 4                  # m / l / row-min scratch (lane-padded)
            + tile * lane_D * 4)                      # finalize f32 accumulator


def _proj_vmem_bytes(tile, D, H, d_k, esize):
    lane_dk = _round_up(d_k, 128)
    lane_D = _round_up(D, 128)
    return (2 * tile * lane_D * esize                 # x block (double-buffered)
            + 3 * D * lane_D * esize                  # fused QKV weight (single-buffered)
            + 2 * 3 * H * tile * lane_dk * esize      # Q/K/V out blocks (double-buffered)
            + 3 * tile * lane_D * 4)                  # f32 (ts, 3D) intermediate


def _choose_seq_tile(S, D, H, d_k, dtype, budget):
    """Largest sequence tile (pref. 512/256 to fill the 256x256 MXU) that fits the budget."""
    esize = jnp.dtype(dtype).itemsize
    sub = _sublane_multiple(dtype)
    cap = _round_up(S, sub)
    tile = _round_up(min(512, cap), sub)
    while tile > sub and max(_flash_vmem_bytes(tile, D, H, d_k, esize),
                             _proj_vmem_bytes(tile, D, H, d_k, esize)) > budget:
        tile = _round_up(tile // 2, sub)
    return max(tile, sub)


def _vmem_limit(estimate, budget):
    lim = min(max(2 * estimate, 32 * 1024 * 1024), budget)
    return int(max(lim, estimate + (4 << 20)))


# --------------------------------------------------------------------------- #
# kernel 1: fused Q/K/V projection, emitted head-major as (B, H, S, d_k)
# --------------------------------------------------------------------------- #
def _qkv_proj_kernel(x_ref, wqkv_ref, q_ref, k_ref, v_ref, *, scale, num_heads, d_k):
    D = num_heads * d_k
    x = x_ref[...]                                               # (ts, D)
    qkv = lax.dot_general(x, wqkv_ref[...], _CONTRACT_LAST,
                          preferred_element_type=jnp.float32)    # (ts, 3D)
    # Head split happens ONCE per token here (not per kv step in kernel 2).
    for h in range(num_heads):
        lo = h * d_k
        q_ref[h] = (qkv[:, lo:lo + d_k] * scale).astype(q_ref.dtype)   # fold 1/sqrt(d_k) into Q
        k_ref[h] = qkv[:, D + lo:D + lo + d_k].astype(k_ref.dtype)
        v_ref[h] = qkv[:, 2 * D + lo:2 * D + lo + d_k].astype(v_ref.dtype)


# --------------------------------------------------------------------------- #
# kernel 2: flash attention + fused output projection + |logit| monitor
# --------------------------------------------------------------------------- #
def _flash_attn_kernel(q_ref, k_ref, v_ref, wo_ref, o_ref, ml_ref,
                       m_sc, l_sc, lo_sc, acc_sc, *,
                       num_heads, seq_len, seq_pad, mxu_dtype):
    ki = pl.program_id(2)
    nk = pl.num_programs(2)
    kv_tile = k_ref.shape[1]

    @pl.when(ki == 0)
    def _init():
        m_sc[...] = jnp.full_like(m_sc, -jnp.inf)
        l_sc[...] = jnp.zeros_like(l_sc)
        lo_sc[...] = jnp.full_like(lo_sc, jnp.inf)
        acc_sc[...] = jnp.zeros_like(acc_sc)

    masked = seq_pad != seq_len                      # static Python bool
    if masked:
        col = lax.broadcasted_iota(jnp.int32, (1, kv_tile), 1) + ki * kv_tile
        key_valid = col < seq_len                    # (1, tk)

    for h in range(num_heads):
        qh = q_ref[h]                                # (tq, d_k), pre-scaled by 1/sqrt(d_k)
        kh = k_ref[h]                                # (tk, d_k)
        vh = v_ref[h]                                # (tk, d_k)
        if mxu_dtype is not None:
            qh = qh.astype(mxu_dtype)
            kh = kh.astype(mxu_dtype)

        s = lax.dot_general(qh, kh, _CONTRACT_LAST,
                            preferred_element_type=jnp.float32)      # (tq, tk)
        if masked:
            s_soft = jnp.where(key_valid, s, -jnp.inf)
            row_min = jnp.min(jnp.where(key_valid, s, jnp.inf), axis=-1, keepdims=True)
        else:
            s_soft = s
            row_min = jnp.min(s, axis=-1, keepdims=True)

        row_max = jnp.max(s_soft, axis=-1, keepdims=True)            # (tq, 1)
        # |logit| monitor: running row-min only (running row-max == m_sc already).
        lo_sc[h] = jnp.minimum(lo_sc[h], row_min)

        m_prev = m_sc[h]                                             # (tq, 1)
        m_new = jnp.maximum(m_prev, row_max)
        alpha = jnp.exp(m_prev - m_new)
        p = jnp.exp(s_soft - m_new)                                  # (tq, tk)

        l_sc[h] = alpha * l_sc[h] + jnp.sum(p, axis=-1, keepdims=True)
        pv_dtype = mxu_dtype if mxu_dtype is not None else vh.dtype
        pv = jnp.dot(p.astype(pv_dtype), vh.astype(pv_dtype),
                     preferred_element_type=jnp.float32)             # (tq, d_k)
        acc_sc[h] = alpha * acc_sc[h] + pv
        m_sc[h] = m_new

    @pl.when(ki == nk - 1)
    def _finalize():
        ctx_dtype = mxu_dtype if mxu_dtype is not None else wo_ref.dtype
        out = jnp.zeros(o_ref.shape, jnp.float32)                    # (tq, D)
        for h in range(num_heads):
            l_h = l_sc[h]
            inv_l = pl.reciprocal(l_h, approx=True)
            inv_l = inv_l * (2.0 - l_h * inv_l)                      # Newton step -> ~f32 accuracy
            ctx_h = (acc_sc[h] * inv_l).astype(ctx_dtype)            # (tq, d_k)
            out = out + lax.dot_general(ctx_h, wo_ref[h], _CONTRACT_STD,
                                        preferred_element_type=jnp.float32)
        o_ref[...] = out.astype(o_ref.dtype)
        # Collapse the monitor to a scalar only once per q-tile.
        ml_ref[0, 0, 0, 0] = jnp.maximum(jnp.max(m_sc[...]), -jnp.min(lo_sc[...]))


# --------------------------------------------------------------------------- #
# wrapper
# --------------------------------------------------------------------------- #
def monitored_attention(x, wq, wk, wv, wo, *, num_heads, mxu_dtype=None):
    """Returns (out [B,S,D], global max|attention logit| scalar)."""
    B, S, D = x.shape
    assert D % num_heads == 0
    d_k = D // num_heads
    scale = 1.0 / math.sqrt(d_k)
    dtype = x.dtype
    esize = jnp.dtype(dtype).itemsize

    budget = (3 * _vmem_capacity_bytes()) // 4          # headroom for compiler scratch
    tile = _choose_seq_tile(S, D, num_heads, d_k, dtype, budget)
    S_pad = _round_up(S, tile)
    n_s = S_pad // tile

    # One-time wrapper-side weight prep (outside the kernels).
    wqkv = jnp.concatenate([wq, wk, wv], axis=0)                       # (3D, D)
    wo_heads = wo.reshape(D, num_heads, d_k).transpose(1, 2, 0)        # (H, d_k, D)
    x_in = x if S_pad == S else jnp.pad(x, ((0, 0), (0, S_pad - S), (0, 0)))

    proj_limit = _vmem_limit(_proj_vmem_bytes(tile, D, num_heads, d_k, esize), budget)
    flash_limit = _vmem_limit(_flash_vmem_bytes(tile, D, num_heads, d_k, esize), budget)

    def _run(single_buffer_weights):
        def w_spec(shape, imap):
            if single_buffer_weights:
                # grid-invariant weights: default double-buffering is pure VMEM waste
                return pl.BlockSpec(shape, imap, pipeline_mode=pl.Buffered(1))
            return pl.BlockSpec(shape, imap)

        # --------------------- kernel 1: fused QKV projection --------------------
        qkv_spec = pl.BlockSpec((None, num_heads, tile, d_k), lambda b, s: (b, 0, s, 0))
        q, k, v = pl.pallas_call(
            partial(_qkv_proj_kernel, scale=scale, num_heads=num_heads, d_k=d_k),
            out_shape=tuple(jax.ShapeDtypeStruct((B, num_heads, S_pad, d_k), dtype)
                            for _ in range(3)),
            grid_spec=pltpu.PrefetchScalarGridSpec(
                num_scalar_prefetch=0,
                grid=(B, n_s),
                in_specs=[
                    pl.BlockSpec((None, tile, D), lambda b, s: (b, s, 0)),   # x
                    w_spec((3 * D, D), lambda b, s: (0, 0)),                 # fused Wqkv
                ],
                out_specs=[qkv_spec, qkv_spec, qkv_spec],
            ),
            compiler_params=pltpu.CompilerParams(
                dimension_semantics=("parallel", "parallel"),
                vmem_limit_bytes=proj_limit),
        )(x_in, wqkv)

        # ---------------- kernel 2: flash attention + out projection -------------
        out_pad, maxlog = pl.pallas_call(
            partial(_flash_attn_kernel, num_heads=num_heads,
                    seq_len=S, seq_pad=S_pad, mxu_dtype=mxu_dtype),
            out_shape=(
                jax.ShapeDtypeStruct((B, S_pad, D), dtype),
                jax.ShapeDtypeStruct((B, n_s, 1, 1), jnp.float32),
            ),
            grid_spec=pltpu.PrefetchScalarGridSpec(
                num_scalar_prefetch=0,
                grid=(B, n_s, n_s),
                in_specs=[
                    pl.BlockSpec((None, num_heads, tile, d_k), lambda b, qi, ki: (b, 0, qi, 0)),
                    pl.BlockSpec((None, num_heads, tile, d_k), lambda b, qi, ki: (b, 0, ki, 0)),
                    pl.BlockSpec((None, num_heads, tile, d_k), lambda b, qi, ki: (b, 0, ki, 0)),
                    w_spec((num_heads, d_k, D), lambda b, qi, ki: (0, 0, 0)),   # Wo (invariant)
                ],
                out_specs=[
                    pl.BlockSpec((None, tile, D), lambda b, qi, ki: (b, qi, 0)),
                    pl.BlockSpec((1, 1, 1, 1), lambda b, qi, ki: (b, qi, 0, 0)),
                ],
                scratch_shapes=[
                    pltpu.VMEM((num_heads, tile, 1), jnp.float32),    # running row max
                    pltpu.VMEM((num_heads, tile, 1), jnp.float32),    # running row sum
                    pltpu.VMEM((num_heads, tile, 1), jnp.float32),    # running row min (monitor)
                    pltpu.VMEM((num_heads, tile, d_k), jnp.float32),  # f32 context accumulator
                ],
            ),
            compiler_params=pltpu.CompilerParams(
                dimension_semantics=("parallel", "parallel", "arbitrary"),
                vmem_limit_bytes=flash_limit),
        )(q, k, v, wo_heads)
        return out_pad, maxlog

    try:
        out_pad, maxlog = _run(single_buffer_weights=True)
    except Exception:
        # Fallback for JAX builds that reject pipeline_mode=pl.Buffered(1).
        out_pad, maxlog = _run(single_buffer_weights=False)

    out = out_pad if S_pad == S else out_pad[:, :S]
    # Equivalent of DistributedAttentionMonitor: global max over batch / q-tiles.
    return out, jnp.max(maxlog)


# --------------------------------------------------------------------------- #
# pure-JAX reference (eval mode, mask=None) and self-test
# --------------------------------------------------------------------------- #
def _reference(x, wq, wk, wv, wo, num_heads):
    B, S, D = x.shape
    d_k = D // num_heads
    with jax.default_matmul_precision("highest"):
        q = (x @ wq.T).reshape(B, S, num_heads, d_k).transpose(0, 2, 1, 3)
        k = (x @ wk.T).reshape(B, S, num_heads, d_k).transpose(0, 2, 1, 3)
        v = (x @ wv.T).reshape(B, S, num_heads, d_k).transpose(0, 2, 1, 3)
        scores = jnp.einsum('bhqd,bhkd->bhqk', q, k) / math.sqrt(d_k)
        max_logit = jnp.max(jnp.abs(scores))
        p = jax.nn.softmax(scores, axis=-1)
        out = jnp.einsum('bhqk,bhkd->bhqd', p, v)
        out = out.transpose(0, 2, 1, 3).reshape(B, S, D)
        return out @ wo.T, max_logit


if __name__ == "__main__":
    def run_case(B, S, D, H, key):
        kx, kq, kk, kv_, ko = jax.random.split(key, 5)
        x = jax.random.normal(kx, (B, S, D), dtype=jnp.float32)
        init_scale = 1.0 / math.sqrt(D)
        wq = jax.random.uniform(kq, (D, D), jnp.float32, -init_scale, init_scale)
        wk = jax.random.uniform(kk, (D, D), jnp.float32, -init_scale, init_scale)
        wv = jax.random.uniform(kv_, (D, D), jnp.float32, -init_scale, init_scale)
        wo = jax.random.uniform(ko, (D, D), jnp.float32, -init_scale, init_scale)

        out, max_logit = monitored_attention(x, wq, wk, wv, wo, num_heads=H)
        out = jax.block_until_ready(out)
        max_logit = jax.block_until_ready(max_logit)

        ref_out, ref_max = _reference(x, wq, wk, wv, wo, H)
        assert out.shape == ref_out.shape, "shape mismatch"
        assert jnp.allclose(out, ref_out, atol=2e-3, rtol=2e-3), "output mismatch"
        assert jnp.allclose(max_logit, ref_max, atol=1e-3, rtol=1e-3), "max-logit mismatch"

    key = jax.random.PRNGKey(0)
    k1, k2 = jax.random.split(key)
    # Small shapes consistent with the module: batch=2, seq=8, d_model=32, heads=4.
    run_case(2, 8, 32, 4, k1)
    # Awkward (non-multiple-of-tile) sequence length exercises the pad/mask path.
    run_case(1, 12, 32, 4, k2)

    print("KERNEL_OK")
</pallas_src>

<mosaic_0001>
module attributes {stable_mosaic.version = 11 : i64} {
  func.func @_qkv_proj_kernel(%arg0: i32, %arg1: i32, %arg2: memref<1x8x32xf32, #tpu.memory_space<vmem>>, %arg3: memref<96x32xf32, #tpu.memory_space<vmem>>, %arg4: memref<1x4x8x8xf32, #tpu.memory_space<vmem>>, %arg5: memref<1x4x8x8xf32, #tpu.memory_space<vmem>>, %arg6: memref<1x4x8x8xf32, #tpu.memory_space<vmem>>) attributes {dimension_semantics = [#tpu.dimension_semantics<parallel>, #tpu.dimension_semantics<parallel>], iteration_bounds = array<i64: 2, 1>, scalar_prefetch = 0 : i64, scratch_operands = 0 : i64, tpu.core_type = #tpu.core_type<tc>, window_params = [{transform_indices = @transform_0, window_bounds = array<i64: 1, 8, 32>}, {pipeline_mode = #tpu.pipeline_mode<synchronous>, transform_indices = @transform_1, window_bounds = array<i64: 96, 32>}, {transform_indices = @transform_2, window_bounds = array<i64: 1, 4, 8, 8>}, {transform_indices = @transform_3, window_bounds = array<i64: 1, 4, 8, 8>}, {transform_indices = @transform_4, window_bounds = array<i64: 1, 4, 8, 8>}]} {
    %c0 = arith.constant 0 : index
    %c0_0 = arith.constant 0 : index
    %c0_1 = arith.constant 0 : index
    %0 = vector.load %arg2[%c0, %c0_0, %c0_1] : memref<1x8x32xf32, #tpu.memory_space<vmem>>, vector<1x8x32xf32>
    %1 = vector.shape_cast %0 : vector<1x8x32xf32> to vector<8x32xf32>
    %c0_2 = arith.constant 0 : index
    %c0_3 = arith.constant 0 : index
    %2 = vector.load %arg3[%c0_2, %c0_3] : memref<96x32xf32, #tpu.memory_space<vmem>>, vector<96x32xf32>
    %cst = arith.constant dense<0.000000e+00> : vector<8x96xf32>
    %3 = tpu.matmul %1, %2, %cst {dimension_numbers = #tpu.dot_dimension_numbers<[1], [1], [0], [0], [0, 0, 1, 0], [], []>} : vector<8x32xf32>, vector<96x32xf32>, vector<8x96xf32> -> vector<8x96xf32>
    %4 = vector.extract_strided_slice %3 {offsets = [0, 0], sizes = [8, 8], strides = [1, 1]} : vector<8x96xf32> to vector<8x8xf32>
    %cst_4 = arith.constant 0.353553385 : f32
    %5 = vector.broadcast %cst_4 : f32 to vector<8x8xf32>
    %6 = arith.mulf %4, %5 : vector<8x8xf32>
    %c0_5 = arith.constant 0 : index
    %c0_6 = arith.constant 0 : index
    %c0_7 = arith.constant 0 : index
    %c0_8 = arith.constant 0 : index
    %7 = vector.load %arg4[%c0_5, %c0_6, %c0_7, %c0_8] : memref<1x4x8x8xf32, #tpu.memory_space<vmem>>, vector<1x1x8x8xf32>
    %8 = vector.shape_cast %7 : vector<1x1x8x8xf32> to vector<8x8xf32>
    %9 = vector.shape_cast %6 : vector<8x8xf32> to vector<1x1x8x8xf32>
    tpu.vector_store %arg4[%c0_5, %c0_6, %c0_7, %c0_8], %9 {strides = array<i32>} : memref<1x4x8x8xf32, #tpu.memory_space<vmem>>, vector<1x1x8x8xf32>,
    %10 = vector.extract_strided_slice %3 {offsets = [0, 32], sizes = [8, 8], strides = [1, 1]} : vector<8x96xf32> to vector<8x8xf32>
    %c0_9 = arith.constant 0 : index
    %c0_10 = arith.constant 0 : index
    %c0_11 = arith.constant 0 : index
    %c0_12 = arith.constant 0 : index
    %11 = vector.load %arg5[%c0_9, %c0_10, %c0_11, %c0_12] : memref<1x4x8x8xf32, #tpu.memory_space<vmem>>, vector<1x1x8x8xf32>
    %12 = vector.shape_cast %11 : vector<1x1x8x8xf32> to vector<8x8xf32>
    %13 = vector.shape_cast %10 : vector<8x8xf32> to vector<1x1x8x8xf32>
    tpu.vector_store %arg5[%c0_9, %c0_10, %c0_11, %c0_12], %13 {strides = array<i32>} : memref<1x4x8x8xf32, #tpu.memory_space<vmem>>, vector<1x1x8x8xf32>,
    %14 = vector.extract_strided_slice %3 {offsets = [0, 64], sizes = [8, 8], strides = [1, 1]} : vector<8x96xf32> to vector<8x8xf32>
    %c0_13 = arith.constant 0 : index
    %c0_14 = arith.constant 0 : index
    %c0_15 = arith.constant 0 : index
    %c0_16 = arith.constant 0 : index
    %15 = vector.load %arg6[%c0_13, %c0_14, %c0_15, %c0_16] : memref<1x4x8x8xf32, #tpu.memory_space<vmem>>, vector<1x1x8x8xf32>
    %16 = vector.shape_cast %15 : vector<1x1x8x8xf32> to vector<8x8xf32>
    %17 = vector.shape_cast %14 : vector<8x8xf32> to vector<1x1x8x8xf32>
    tpu.vector_store %arg6[%c0_13, %c0_14, %c0_15, %c0_16], %17 {strides = array<i32>} : memref<1x4x8x8xf32, #tpu.memory_space<vmem>>, vector<1x1x8x8xf32>,
    %18 = vector.extract_strided_slice %3 {offsets = [0, 8], sizes = [8, 8], strides = [1, 1]} : vector<8x96xf32> to vector<8x8xf32>
    %cst_17 = arith.constant 0.353553385 : f32
    %19 = vector.broadcast %cst_17 : f32 to vector<8x8xf32>
    %20 = arith.mulf %18, %19 : vector<8x8xf32>
    %c0_18 = arith.constant 0 : index
    %c1 = arith.constant 1 : index
    %c0_19 = arith.constant 0 : index
    %c0_20 = arith.constant 0 : index
    %21 = vector.load %arg4[%c0_18, %c1, %c0_19, %c0_20] : memref<1x4x8x8xf32, #tpu.memory_space<vmem>>, vector<1x1x8x8xf32>
    %22 = vector.shape_cast %21 : vector<1x1x8x8xf32> to vector<8x8xf32>
    %23 = vector.shape_cast %20 : vector<8x8xf32> to vector<1x1x8x8xf32>
    tpu.vector_store %arg4[%c0_18, %c1, %c0_19, %c0_20], %23 {strides = array<i32>} : memref<1x4x8x8xf32, #tpu.memory_space<vmem>>, vector<1x1x8x8xf32>,
    %24 = vector.extract_strided_slice %3 {offsets = [0, 40], sizes = [8, 8], strides = [1, 1]} : vector<8x96xf32> to vector<8x8xf32>
    %c0_21 = arith.constant 0 : index
    %c1_22 = arith.constant 1 : index
    %c0_23 = arith.constant 0 : index
    %c0_24 = arith.constant 0 : index
    %25 = vector.load %arg5[%c0_21, %c1_22, %c0_23, %c0_24] : memref<1x4x8x8xf32, #tpu.memory_space<vmem>>, vector<1x1x8x8xf32>
    %26 = vector.shape_cast %25 : vector<1x1x8x8xf32> to vector<8x8xf32>
    %27 = vector.shape_cast %24 : vector<8x8xf32> to vector<1x1x8x8xf32>
    tpu.vector_store %arg5[%c0_21, %c1_22, %c0_23, %c0_24], %27 {strides = array<i32>} : memref<1x4x8x8xf32, #tpu.memory_space<vmem>>, vector<1x1x8x8xf32>,
    %28 = vector.extract_strided_slice %3 {offsets = [0, 72], sizes = [8, 8], strides = [1, 1]} : vector<8x96xf32> to vector<8x8xf32>
    %c0_25 = arith.constant 0 : index
    %c1_26 = arith.constant 1 : index
    %c0_27 = arith.constant 0 : index
    %c0_28 = arith.constant 0 : index
    %29 = vector.load %arg6[%c0_25, %c1_26, %c0_27, %c0_28] : memref<1x4x8x8xf32, #tpu.memory_space<vmem>>, vector<1x1x8x8xf32>
    %30 = vector.shape_cast %29 : vector<1x1x8x8xf32> to vector<8x8xf32>
    %31 = vector.shape_cast %28 : vector<8x8xf32> to vector<1x1x8x8xf32>
    tpu.vector_store %arg6[%c0_25, %c1_26, %c0_27, %c0_28], %31 {strides = array<i32>} : memref<1x4x8x8xf32, #tpu.memory_space<vmem>>, vector<1x1x8x8xf32>,
    %32 = vector.extract_strided_slice %3 {offsets = [0, 16], sizes = [8, 8], strides = [1, 1]} : vector<8x96xf32> to vector<8x8xf32>
    %cst_29 = arith.constant 0.353553385 : f32
    %33 = vector.broadcast %cst_29 : f32 to vector<8x8xf32>
    %34 = arith.mulf %32, %33 : vector<8x8xf32>
    %c0_30 = arith.constant 0 : index
    %c2 = arith.constant 2 : index
    %c0_31 = arith.constant 0 : index
    %c0_32 = arith.constant 0 : index
    %35 = vector.load %arg4[%c0_30, %c2, %c0_31, %c0_32] : memref<1x4x8x8xf32, #tpu.memory_space<vmem>>, vector<1x1x8x8xf32>
    %36 = vector.shape_cast %35 : vector<1x1x8x8xf32> to vector<8x8xf32>
    %37 = vector.shape_cast %34 : vector<8x8xf32> to vector<1x1x8x8xf32>
    tpu.vector_store %arg4[%c0_30, %c2, %c0_31, %c0_32], %37 {strides = array<i32>} : memref<1x4x8x8xf32, #tpu.memory_space<vmem>>, vector<1x1x8x8xf32>,
    %38 = vector.extract_strided_slice %3 {offsets = [0, 48], sizes = [8, 8], strides = [1, 1]} : vector<8x96xf32> to vector<8x8xf32>
    %c0_33 = arith.constant 0 : index
    %c2_34 = arith.constant 2 : index
    %c0_35 = arith.constant 0 : index
    %c0_36 = arith.constant 0 : index
    %39 = vector.load %arg5[%c0_33, %c2_34, %c0_35, %c0_36] : memref<1x4x8x8xf32, #tpu.memory_space<vmem>>, vector<1x1x8x8xf32>
    %40 = vector.shape_cast %39 : vector<1x1x8x8xf32> to vector<8x8xf32>
    %41 = vector.shape_cast %38 : vector<8x8xf32> to vector<1x1x8x8xf32>
    tpu.vector_store %arg5[%c0_33, %c2_34, %c0_35, %c0_36], %41 {strides = array<i32>} : memref<1x4x8x8xf32, #tpu.memory_space<vmem>>, vector<1x1x8x8xf32>,
    %42 = vector.extract_strided_slice %3 {offsets = [0, 80], sizes = [8, 8], strides = [1, 1]} : vector<8x96xf32> to vector<8x8xf32>
    %c0_37 = arith.constant 0 : index
    %c2_38 = arith.constant 2 : index
    %c0_39 = arith.constant 0 : index
    %c0_40 = arith.constant 0 : index
    %43 = vector.load %arg6[%c0_37, %c2_38, %c0_39, %c0_40] : memref<1x4x8x8xf32, #tpu.memory_space<vmem>>, vector<1x1x8x8xf32>
    %44 = vector.shape_cast %43 : vector<1x1x8x8xf32> to vector<8x8xf32>
    %45 = vector.shape_cast %42 : vector<8x8xf32> to vector<1x1x8x8xf32>
    tpu.vector_store %arg6[%c0_37, %c2_38, %c0_39, %c0_40], %45 {strides = array<i32>} : memref<1x4x8x8xf32, #tpu.memory_space<vmem>>, vector<1x1x8x8xf32>,
    %46 = vector.extract_strided_slice %3 {offsets = [0, 24], sizes = [8, 8], strides = [1, 1]} : vector<8x96xf32> to vector<8x8xf32>
    %cst_41 = arith.constant 0.353553385 : f32
    %47 = vector.broadcast %cst_41 : f32 to vector<8x8xf32>
    %48 = arith.mulf %46, %47 : vector<8x8xf32>
    %c0_42 = arith.constant 0 : index
    %c3 = arith.constant 3 : index
    %c0_43 = arith.constant 0 : index
    %c0_44 = arith.constant 0 : index
    %49 = vector.load %arg4[%c0_42, %c3, %c0_43, %c0_44] : memref<1x4x8x8xf32, #tpu.memory_space<vmem>>, vector<1x1x8x8xf32>
    %50 = vector.shape_cast %49 : vector<1x1x8x8xf32> to vector<8x8xf32>
    %51 = vector.shape_cast %48 : vector<8x8xf32> to vector<1x1x8x8xf32>
    tpu.vector_store %arg4[%c0_42, %c3, %c0_43, %c0_44], %51 {strides = array<i32>} : memref<1x4x8x8xf32, #tpu.memory_space<vmem>>, vector<1x1x8x8xf32>,
    %52 = vector.extract_strided_slice %3 {offsets = [0, 56], sizes = [8, 8], strides = [1, 1]} : vector<8x96xf32> to vector<8x8xf32>
    %c0_45 = arith.constant 0 : index
    %c3_46 = arith.constant 3 : index
    %c0_47 = arith.constant 0 : index
    %c0_48 = arith.constant 0 : index
    %53 = vector.load %arg5[%c0_45, %c3_46, %c0_47, %c0_48] : memref<1x4x8x8xf32, #tpu.memory_space<vmem>>, vector<1x1x8x8xf32>
    %54 = vector.shape_cast %53 : vector<1x1x8x8xf32> to vector<8x8xf32>
    %55 = vector.shape_cast %52 : vector<8x8xf32> to vector<1x1x8x8xf32>
    tpu.vector_store %arg5[%c0_45, %c3_46, %c0_47, %c0_48], %55 {strides = array<i32>} : memref<1x4x8x8xf32, #tpu.memory_space<vmem>>, vector<1x1x8x8xf32>,
    %56 = vector.extract_strided_slice %3 {offsets = [0, 88], sizes = [8, 8], strides = [1, 1]} : vector<8x96xf32> to vector<8x8xf32>
    %c0_49 = arith.constant 0 : index
    %c3_50 = arith.constant 3 : index
    %c0_51 = arith.constant 0 : index
    %c0_52 = arith.constant 0 : index
    %57 = vector.load %arg6[%c0_49, %c3_50, %c0_51, %c0_52] : memref<1x4x8x8xf32, #tpu.memory_space<vmem>>, vector<1x1x8x8xf32>
    %58 = vector.shape_cast %57 : vector<1x1x8x8xf32> to vector<8x8xf32>
    %59 = vector.shape_cast %56 : vector<8x8xf32> to vector<1x1x8x8xf32>
    tpu.vector_store %arg6[%c0_49, %c3_50, %c0_51, %c0_52], %59 {strides = array<i32>} : memref<1x4x8x8xf32, #tpu.memory_space<vmem>>, vector<1x1x8x8xf32>,
    return
  }
  func.func @transform_0(%arg0: i32, %arg1: i32) -> (i32, i32, i32) {
    %c0_i32 = arith.constant 0 : i32
    %c0_i32_0 = arith.constant 0 : i32
    return %arg0, %arg1, %c0_i32 : i32, i32, i32
  }
  func.func @transform_1(%arg0: i32, %arg1: i32) -> (i32, i32) {
    %c0_i32 = arith.constant 0 : i32
    %c0_i32_0 = arith.constant 0 : i32
    %c0_i32_1 = arith.constant 0 : i32
    return %c0_i32, %c0_i32_0 : i32, i32
  }
  func.func @transform_2(%arg0: i32, %arg1: i32) -> (i32, i32, i32, i32) {
    %c0_i32 = arith.constant 0 : i32
    %c0_i32_0 = arith.constant 0 : i32
    %c0_i32_1 = arith.constant 0 : i32
    return %arg0, %c0_i32, %arg1, %c0_i32_0 : i32, i32, i32, i32
  }
  func.func @transform_3(%arg0: i32, %arg1: i32) -> (i32, i32, i32, i32) {
    %c0_i32 = arith.constant 0 : i32
    %c0_i32_0 = arith.constant 0 : i32
    %c0_i32_1 = arith.constant 0 : i32
    return %arg0, %c0_i32, %arg1, %c0_i32_0 : i32, i32, i32, i32
  }
  func.func @transform_4(%arg0: i32, %arg1: i32) -> (i32, i32, i32, i32) {
    %c0_i32 = arith.constant 0 : i32
    %c0_i32_0 = arith.constant 0 : i32
    %c0_i32_1 = arith.constant 0 : i32
    return %arg0, %c0_i32, %arg1, %c0_i32_0 : i32, i32, i32, i32
  }
}

module attributes {stable_mosaic.version = 11 : i64} {
  func.func @_qkv_proj_kernel(%arg0: i32, %arg1: i32, %arg2: memref<1x8x32xf32, #tpu.memory_space<vmem>>, %arg3: memref<96x32xf32, #tpu.memory_space<vmem>>, %arg4: memref<1x4x8x8xf32, #tpu.memory_space<vmem>>, %arg5: memref<1x4x8x8xf32, #tpu.memory_space<vmem>>, %arg6: memref<1x4x8x8xf32, #tpu.memory_space<vmem>>) attributes {dimension_semantics = [#tpu.dimension_semantics<parallel>, #tpu.dimension_semantics<parallel>], iteration_bounds = array<i64: 2, 1>, scalar_prefetch = 0 : i64, scratch_operands = 0 : i64, tpu.core_type = #tpu.core_type<tc>, window_params = [{transform_indices = @transform_0, window_bounds = array<i64: 1, 8, 32>}, {pipeline_mode = #tpu.pipeline_mode<synchronous>, transform_indices = @transform_1, window_bounds = array<i64: 96, 32>}, {transform_indices = @transform_2, window_bounds = array<i64: 1, 4, 8, 8>}, {transform_indices = @transform_3, window_bounds = array<i64: 1, 4, 8, 8>}, {transform_indices = @transform_4, window_bounds = array<i64: 1, 4, 8, 8>}]} {
    %c0 = arith.constant 0 : index
    %c0_0 = arith.constant 0 : index
    %c0_1 = arith.constant 0 : index
    %0 = vector.load %arg2[%c0, %c0_0, %c0_1] : memref<1x8x32xf32, #tpu.memory_space<vmem>>, vector<1x8x32xf32>
    %1 = vector.shape_cast %0 : vector<1x8x32xf32> to vector<8x32xf32>
    %c0_2 = arith.constant 0 : index
    %c0_3 = arith.constant 0 : index
    %2 = vector.load %arg3[%c0_2, %c0_3] : memref<96x32xf32, #tpu.memory_space<vmem>>, vector<96x32xf32>
    %cst = arith.constant dense<0.000000e+00> : vector<8x96xf32>
    %3 = tpu.matmul %1, %2, %cst {dimension_numbers = #tpu.dot_dimension_numbers<[1], [1], [0], [0], [0, 0, 1, 0], [], []>} : vector<8x32xf32>, vector<96x32xf32>, vector<8x96xf32> -> vector<8x96xf32>
    %4 = vector.extract_strided_slice %3 {offsets = [0, 0], sizes = [8, 8], strides = [1, 1]} : vector<8x96xf32> to vector<8x8xf32>
    %cst_4 = arith.constant 0.353553385 : f32
    %5 = vector.broadcast %cst_4 : f32 to vector<8x8xf32>
    %6 = arith.mulf %4, %5 : vector<8x8xf32>
    %c0_5 = arith.constant 0 : index
    %c0_6 = arith.constant 0 : index
    %c0_7 = arith.constant 0 : index
    %c0_8 = arith.constant 0 : index
    %7 = vector.load %arg4[%c0_5, %c0_6, %c0_7, %c0_8] : memref<1x4x8x8xf32, #tpu.memory_space<vmem>>, vector<1x1x8x8xf32>
    %8 = vector.shape_cast %7 : vector<1x1x8x8xf32> to vector<8x8xf32>
    %9 = vector.shape_cast %6 : vector<8x8xf32> to vector<1x1x8x8xf32>
    tpu.vector_store %arg4[%c0_5, %c0_6, %c0_7, %c0_8], %9 {strides = array<i32>} : memref<1x4x8x8xf32, #tpu.memory_space<vmem>>, vector<1x1x8x8xf32>,
    %10 = vector.extract_strided_slice %3 {offsets = [0, 32], sizes = [8, 8], strides = [1, 1]} : vector<8x96xf32> to vector<8x8xf32>
    %c0_9 = arith.constant 0 : index
    %c0_10 = arith.constant 0 : index
    %c0_11 = arith.constant 0 : index
    %c0_12 = arith.constant 0 : index
    %11 = vector.load %arg5[%c0_9, %c0_10, %c0_11, %c0_12] : memref<1x4x8x8xf32, #tpu.memory_space<vmem>>, vector<1x1x8x8xf32>
    %12 = vector.shape_cast %11 : vector<1x1x8x8xf32> to vector<8x8xf32>
    %13 = vector.shape_cast %10 : vector<8x8xf32> to vector<1x1x8x8xf32>
    tpu.vector_store %arg5[%c0_9, %c0_10, %c0_11, %c0_12], %13 {strides = array<i32>} : memref<1x4x8x8xf32, #tpu.memory_space<vmem>>, vector<1x1x8x8xf32>,
    %14 = vector.extract_strided_slice %3 {offsets = [0, 64], sizes = [8, 8], strides = [1, 1]} : vector<8x96xf32> to vector<8x8xf32>
    %c0_13 = arith.constant 0 : index
    %c0_14 = arith.constant 0 : index
    %c0_15 = arith.constant 0 : index
    %c0_16 = arith.constant 0 : index
    %15 = vector.load %arg6[%c0_13, %c0_14, %c0_15, %c0_16] : memref<1x4x8x8xf32, #tpu.memory_space<vmem>>, vector<1x1x8x8xf32>
    %16 = vector.shape_cast %15 : vector<1x1x8x8xf32> to vector<8x8xf32>
    %17 = vector.shape_cast %14 : vector<8x8xf32> to vector<1x1x8x8xf32>
    tpu.vector_store %arg6[%c0_13, %c0_14, %c0_15, %c0_16], %17 {strides = array<i32>} : memref<1x4x8x8xf32, #tpu.memory_space<vmem>>, vector<1x1x8x8xf32>,
    %18 = vector.extract_strided_slice %3 {offsets = [0, 8], sizes = [8, 8], strides = [1, 1]} : vector<8x96xf32> to vector<8x8xf32>
    %cst_17 = arith.constant 0.353553385 : f32
    %19 = vector.broadcast %cst_17 : f32 to vector<8x8xf32>
    %20 = arith.mulf %18, %19 : vector<8x8xf32>
    %c0_18 = arith.constant 0 : index
    %c1 = arith.constant 1 : index
    %c0_19 = arith.constant 0 : index
    %c0_20 = arith.constant 0 : index
    %21 = vector.load %arg4[%c0_18, %c1, %c0_19, %c0_20] : memref<1x4x8x8xf32, #tpu.memory_space<vmem>>, vector<1x1x8x8xf32>
    %22 = vector.shape_cast %21 : vector<1x1x8x8xf32> to vector<8x8xf32>
    %23 = vector.shape_cast %20 : vector<8x8xf32> to vector<1x1x8x8xf32>
    tpu.vector_store %arg4[%c0_18, %c1, %c0_19, %c0_20], %23 {strides = array<i32>} : memref<1x4x8x8xf32, #tpu.memory_space<vmem>>, vector<1x1x8x8xf32>,
    %24 = vector.extract_strided_slice %3 {offsets = [0, 40], sizes = [8, 8], strides = [1, 1]} : vector<8x96xf32> to vector<8x8xf32>
    %c0_21 = arith.constant 0 : index
    %c1_22 = arith.constant 1 : index
    %c0_23 = arith.constant 0 : index
    %c0_24 = arith.constant 0 : index
    %25 = vector.load %arg5[%c0_21, %c1_22, %c0_23, %c0_24] : memref<1x4x8x8xf32, #tpu.memory_space<vmem>>, vector<1x1x8x8xf32>
    %26 = vector.shape_cast %25 : vector<1x1x8x8xf32> to vector<8x8xf32>
    %27 = vector.shape_cast %24 : vector<8x8xf32> to vector<1x1x8x8xf32>
    tpu.vector_store %arg5[%c0_21, %c1_22, %c0_23, %c0_24], %27 {strides = array<i32>} : memref<1x4x8x8xf32, #tpu.memory_space<vmem>>, vector<1x1x8x8xf32>,
    %28 = vector.extract_strided_slice %3 {offsets = [0, 72], sizes = [8, 8], strides = [1, 1]} : vector<8x96xf32> to vector<8x8xf32>
    %c0_25 = arith.constant 0 : index
    %c1_26 = arith.constant 1 : index
    %c0_27 = arith.constant 0 : index
    %c0_28 = arith.constant 0 : index
    %29 = vector.load %arg6[%c0_25, %c1_26, %c0_27, %c0_28] : memref<1x4x8x8xf32, #tpu.memory_space<vmem>>, vector<1x1x8x8xf32>
    %30 = vector.shape_cast %29 : vector<1x1x8x8xf32> to vector<8x8xf32>
    %31 = vector.shape_cast %28 : vector<8x8xf32> to vector<1x1x8x8xf32>
    tpu.vector_store %arg6[%c0_25, %c1_26, %c0_27, %c0_28], %31 {strides = array<i32>} : memref<1x4x8x8xf32, #tpu.memory_space<vmem>>, vector<1x1x8x8xf32>,
    %32 = vector.extract_strided_slice %3 {offsets = [0, 16], sizes = [8, 8], strides = [1, 1]} : vector<8x96xf32> to vector<8x8xf32>
    %cst_29 = arith.constant 0.353553385 : f32
    %33 = vector.broadcast %cst_29 : f32 to vector<8x8xf32>
    %34 = arith.mulf %32, %33 : vector<8x8xf32>
    %c0_30 = arith.constant 0 : index
    %c2 = arith.constant 2 : index
    %c0_31 = arith.constant 0 : index
    %c0_32 = arith.constant 0 : index
    %35 = vector.load %arg4[%c0_30, %c2, %c0_31, %c0_32] : memref<1x4x8x8xf32, #tpu.memory_space<vmem>>, vector<1x1x8x8xf32>
    %36 = vector.shape_cast %35 : vector<1x1x8x8xf32> to vector<8x8xf32>
    %37 = vector.shape_cast %34 : vector<8x8xf32> to vector<1x1x8x8xf32>
    tpu.vector_store %arg4[%c0_30, %c2, %c0_31, %c0_32], %37 {strides = array<i32>} : memref<1x4x8x8xf32, #tpu.memory_space<vmem>>, vector<1x1x8x8xf32>,
    %38 = vector.extract_strided_slice %3 {offsets = [0, 48], sizes = [8, 8], strides = [1, 1]} : vector<8x96xf32> to vector<8x8xf32>
    %c0_33 = arith.constant 0 : index
    %c2_34 = arith.constant 2 : index
    %c0_35 = arith.constant 0 : index
    %c0_36 = arith.constant 0 : index
    %39 = vector.load %arg5[%c0_33, %c2_34, %c0_35, %c0_36] : memref<1x4x8x8xf32, #tpu.memory_space<vmem>>, vector<1x1x8x8xf32>
    %40 = vector.shape_cast %39 : vector<1x1x8x8xf32> to vector<8x8xf32>
    %41 = vector.shape_cast %38 : vector<8x8xf32> to vector<1x1x8x8xf32>
    tpu.vector_store %arg5[%c0_33, %c2_34, %c0_35, %c0_36], %41 {strides = array<i32>} : memref<1x4x8x8xf32, #tpu.memory_space<vmem>>, vector<1x1x8x8xf32>,
    %42 = vector.extract_strided_slice %3 {offsets = [0, 80], sizes = [8, 8], strides = [1, 1]} : vector<8x96xf32> to vector<8x8xf32>
    %c0_37 = arith.constant 0 : index
    %c2_38 = arith.constant 2 : index
    %c0_39 = arith.constant 0 : index
    %c0_40 = arith.constant 0 : index
    %43 = vector.load %arg6[%c0_37, %c2_38, %c0_39, %c0_40] : memref<1x4x8x8xf32, #tpu.memory_space<vmem>>, vector<1x1x8x8xf32>
    %44 = vector.shape_cast %43 : vector<1x1x8x8xf32> to vector<8x8xf32>
    %45 = vector.shape_cast %42 : vector<8x8xf32> to vector<1x1x8x8xf32>
    tpu.vector_store %arg6[%c0_37, %c2_38, %c0_39, %c0_40], %45 {strides = array<i32>} : memref<1x4x8x8xf32, #tpu.memory_space<vmem>>, vector<1x1x8x8xf32>,
    %46 = vector.extract_strided_slice %3 {offsets = [0, 24], sizes = [8, 8], strides = [1, 1]} : vector<8x96xf32> to vector<8x8xf32>
    %cst_41 = arith.constant 0.353553385 : f32
    %47 = vector.broadcast %cst_41 : f32 to vector<8x8xf32>
    %48 = arith.mulf %46, %47 : vector<8x8xf32>
    %c0_42 = arith.constant 0 : index
    %c3 = arith.constant 3 : index
    %c0_43 = arith.constant 0 : index
    %c0_44 = arith.constant 0 : index
    %49 = vector.load %arg4[%c0_42, %c3, %c0_43, %c0_44] : memref<1x4x8x8xf32, #tpu.memory_space<vmem>>, vector<1x1x8x8xf32>
    %50 = vector.shape_cast %49 : vector<1x1x8x8xf32> to vector<8x8xf32>
    %51 = vector.shape_cast %48 : vector<8x8xf32> to vector<1x1x8x8xf32>
    tpu.vector_store %arg4[%c0_42, %c3, %c0_43, %c0_44], %51 {strides = array<i32>} : memref<1x4x8x8xf32, #tpu.memory_space<vmem>>, vector<1x1x8x8xf32>,
    %52 = vector.extract_strided_slice %3 {offsets = [0, 56], sizes = [8, 8], strides = [1, 1]} : vector<8x96xf32> to vector<8x8xf32>
    %c0_45 = arith.constant 0 : index
    %c3_46 = arith.constant 3 : index
    %c0_47 = arith.constant 0 : index
    %c0_48 = arith.constant 0 : index
    %53 = vector.load %arg5[%c0_45, %c3_46, %c0_47, %c0_48] : memref<1x4x8x8xf32, #tpu.memory_space<vmem>>, vector<1x1x8x8xf32>
    %54 = vector.shape_cast %53 : vector<1x1x8x8xf32> to vector<8x8xf32>
    %55 = vector.shape_cast %52 : vector<8x8xf32> to vector<1x1x8x8xf32>
    tpu.vector_store %arg5[%c0_45, %c3_46, %c0_47, %c0_48], %55 {strides = array<i32>} : memref<1x4x8x8xf32, #tpu.memory_space<vmem>>, vector<1x1x8x8xf32>,
    %56 = vector.extract_strided_slice %3 {offsets = [0, 88], sizes = [8, 8], strides = [1, 1]} : vector<8x96xf32> to vector<8x8xf32>
    %c0_49 = arith.constant 0 : index
    %c3_50 = arith.constant 3 : index
    %c0_51 = arith.constant 0 : index
    %c0_52 = arith.constant 0 : index
    %57 = vector.load %arg6[%c0_49, %c3_50, %c0_51, %c0_52] : memref<1x4x8x8xf32, #tpu.memory_space<vmem>>, vector<1x1x8x8xf32>
    %58 = vector.shape_cast %57 : vector<1x1x8x8xf32> to vector<8x8xf32>
    %59 = vector.shape_cast %56 : vector<8x8xf32> to vector<1x1x8x8xf32>
    tpu.vector_store %arg6[%c0_49, %c3_50, %c0_51, %c0_52], %59 {strides = array<i32>} : memref<1x4x8x8xf32, #tpu.memory_space<vmem>>, vector<1x1x8x8xf32>,
    return
  }
  func.func @transform_0(%arg0: i32, %arg1: i32) -> (i32, i32, i32) {
    %c0_i32 = arith.constant 0 : i32
    %c0_i32_0 = arith.constant 0 : i32
    return %arg0, %arg1, %c0_i32 : i32, i32, i32
  }
  func.func @transform_1(%arg0: i32, %arg1: i32) -> (i32, i32) {
    %c0_i32 = arith.constant 0 : i32
    %c0_i32_0 = arith.constant 0 : i32
    %c0_i32_1 = arith.constant 0 : i32
    return %c0_i32, %c0_i32_0 : i32, i32
  }
  func.func @transform_2(%arg0: i32, %arg1: i32) -> (i32, i32, i32, i32) {
    %c0_i32 = arith.constant 0 : i32
    %c0_i32_0 = arith.constant 0 : i32
    %c0_i32_1 = arith.constant 0 : i32
    return %arg0, %c0_i32, %arg1, %c0_i32_0 : i32, i32, i32, i32
  }
  func.func @transform_3(%arg0: i32, %arg1: i32) -> (i32, i32, i32, i32) {
    %c0_i32 = arith.constant 0 : i32
    %c0_i32_0 = arith.constant 0 : i32
    %c0_i32_1 = arith.constant 0 : i32
    return %arg0, %c0_i32, %arg1, %c0_i32_0 : i32, i32, i32, i32
  }
  func.func @transform_4(%arg0: i32, %arg1: i32) -> (i32, i32, i32, i32) {
    %c0_i32 = arith.constant 0 : i32
    %c0_i32_0 = arith.constant 0 : i32
    %c0_i32_1 = arith.constant 0 : i32
    return %arg0, %c0_i32, %arg1, %c0_i32_0 : i32, i32, i32, i32
  }
}

</mosaic_0001>

<bundles_post_ra>
// kernel: tpu_custom_call.1
= control target key start
LH: loop header
LB: loop body
LE: loop exit
PB: predicated region body
PF: predicated region fallthrough
CT: control target
= control target key end

     0   :  { %10 = vsyncpa [#allocation3], 0  ;;  %s1286_s0 = inlined_call_operand.vmem [shape: f32[2,8,32], index: 0, kind: input, shape index: {}]   ;;  %s1287_s1 = inlined_call_operand.vmem [shape: f32[96,32], index: 1, kind: input, shape index: {}]   ;;  %s1288_s2 = inlined_call_operand.hbm [shape: f32[2,4,8,8], index: 2, kind: output, shape index: {0}]   ;;  %s1289_s3 = inlined_call_operand.hbm [shape: f32[2,4,8,8], index: 3, kind: output, shape index: {1}]   ;;  %s1290_s4 = inlined_call_operand.hbm [shape: f32[2,4,8,8], index: 4, kind: output, shape index: {2}]  }
   0x1   :  { %12 = vsyncpa [#allocation3 + $0x1], 0 }
   0x2   :  { %13 = vsyncpa [#allocation5], 0 }
   0x3   :  { %15 = vsyncpa [#allocation5 + $0x1], 0  ;;  %s994_s15 = smov 0   ;;  %s996_s16 = smov 0  }
   0x4   :  { %s998_s17 = smov 0   ;;  %s1000_s18 = smov 0  }
   0x5   :  { %s1002_s19 = smov 0   ;;  %s1004_s20 = smov 0  }
   0x6 LB: > { %s620_s21 = sadd.s32 4294967295, %s948_s20   ;;  %s1291_s22 = sadd.s32 4294967294, %s948_s20   ;;  %s948_s20 = sphi %s1004_s20, %s21_s20   ;;  %s944_s19 = sphi %s1002_s19, %s1303_s19   ;;  %s940_s18 = sphi %s1000_s18, %s1302_s18   ;;  %s936_s17 = sphi %s998_s17, %s1301_s17   ;;  %s932_s16 = sphi %s996_s16, %s1300_s16   ;;  %s928_s15 = sphi %s994_s15, %s1299_s15  }
   0x7   : > { %s33_s23 = sadd.s32 1, %s944_s19  ;;  %s91_s24 = sadd.s32 1, %s936_s17 }
   0x8   : > { %p35_p0 = scmp.ge.s32.totalorder %s33_s23, 2  ;;  %p101_p1 = scmp.ne.s32.totalorder %s936_s17, %s932_s16 }
   0x9   : > { %p102_p2 = scmp.eq.s32.totalorder %s620_s21, 1  ;;  %p107_p3 = scmp.ne.s32.totalorder %s932_s16, %s928_s15 }
   0xa   : > { %s1305_s23 = smov (%p35_p0, %s33_s23), 0  ;;  %p108_p5 = scmp.eq.s32.totalorder %s1291_s22, 1 }
   0xb   : > { %p1036_p4 = por %p102_p2, %p101_p1  ;;  %s86_s26 = ssub.s32 %s944_s19, %s1305_s23 }
   0xc   : > { %p624_p6 = scmp.ge.s32.totalorder %s948_s20, 1  ;;  %p89_p7 = scmp.eq.s32.totalorder %s86_s26, 0 }
   0xd   : > { %p1045_p8 = por %p108_p5, %p107_p3  ;;  %p195_p9 = scmp.lt.s32.totalorder %s948_s20, 3 }
   0xe   : > { %s1051_s28 = scalar_select %p89_p7, %s936_s17, %s91_s24  }
   0xf   : > { %p196_p10 = pnand %p624_p6, %p195_p9 }
  0x10   : > { %v241_v0 = vld [vmem:[%s1287_s1] sm:$0xff] (!%p196_p10)  ;;  %v242_v1 = vld [vmem:[%s1287_s1 + $0x8] sm:$0xff] (!%p196_p10)  ;;  %vm253_vm0 = vcmask (!%p196_p10), 261120   ;;  %v950_v2 = vmov (!%p196_p10), 0.0|0.0   ;;  %vm951_vm2 = vmmov (!%p196_p10), 0   ;;  %v952_v5 = vmov (!%p196_p10), 0.0  }
  0x11   : > { %199 = sbr.rel (%p196_p10) target bundleno = 461 (0x1cd), region = 28  ;;  %705 = vmatprep.subr.bf16.mxu0 (!%p196_p10), %v950_v2  ;;  %v706_v3 = vpack.c.bf16 (!%p196_p10), %v242_v1, %v241_v0  ;;  %vm1061_vm1 = vmpackc.low (!%p196_p10), %vm253_vm0, %vm253_vm0  ;;  %702 = vmatprep.mubr.msk.f32.mxu0 (!%p196_p10), %vm951_vm2, %v952_v5  ;;  %v243_v6 = vld [vmem:[%s1287_s1 + $0x10] sm:$0xff] (!%p196_p10)  ;;  %v244_v7 = vld [vmem:[%s1287_s1 + $0x18] sm:$0xff] (!%p196_p10)  ;;  %p233_p11 = scmp.lt.s32.totalorder (!%p196_p10), %s940_s18, 1  ;;  %vm364_vm3 = vcmask (!%p196_p10), 64512  }
  0x12   : > { %v710_v8 = vpack.c.bf16 (!%p196_p10), %v244_v7, %v243_v6  ;;  %v245_v9 = vld [vmem:[%s1287_s1 + $0x20] sm:$0xff] (!%p196_p10)  ;;  %v246_v10 = vld [vmem:[%s1287_s1 + $0x28] sm:$0xff] (!%p196_p10)  ;;  %v247_v12 = vld [vmem:[%s1287_s1 + $0x30] sm:$0xff] (!%p196_p10)  ;;  %s216_s30 = sand.u32 (!%p196_p10), 1, %s932_s16   ;;  %s953_s6 = smov (!%p196_p10), 80  }
  0x13   : > { %708 = vmatpush3.bf16.xpose.msk.msra.mxu0 (!%p196_p10), %vm1061_vm1, %v706_v3  ;;  %v714_v11 = vpack.c.bf16 (!%p196_p10), %v246_v10, %v245_v9  ;;  %v248_v13 = vld [vmem:[%s1287_s1 + $0x38] sm:$0xff] (!%p196_p10)  ;;  %v249_v15 = vld [vmem:[%s1287_s1 + $0x40] sm:$0xff] (!%p196_p10)  ;;  %v250_v16 = vld [vmem:[%s1287_s1 + $0x48] sm:$0xff] (!%p196_p10)  ;;  %s1116_s5 = sshll.u32 (!%p196_p10), %s216_s30, 5  ;;  %s954_s7 = smov (!%p196_p10), 96  }
  0x14   : > { %709 = vmatprep.subr.bf16.mxu0 (!%p196_p10), %v950_v2  ;;  %v718_v14 = vpack.c.bf16 (!%p196_p10), %v248_v13, %v247_v12  ;;  %v722_v17 = vpack.c.bf16 (!%p196_p10), %v250_v16, %v249_v15  ;;  %v251_v18 = vld [vmem:[%s1287_s1 + $0x50] sm:$0xff] (!%p196_p10)  ;;  %v252_v19 = vld [vmem:[%s1287_s1 + $0x58] sm:$0xff] (!%p196_p10)  ;;  %s1119_s8 = scalar_lea.vmem (!%p196_p10), [#allocation2], %s1116_s5  ;;  %s955_s9 = smov (!%p196_p10), 72  }
  0x15   : > { %v726_v20 = vpack.c.bf16 (!%p196_p10), %v252_v19, %v251_v18  ;;  %s956_s10 = smov (!%p196_p10), 88   ;;  %s957_s11 = smov (!%p196_p10), 64  }
  0x16   : > { %s958_s12 = smov (!%p196_p10), 120   ;;  %s961_s24 = smov (!%p196_p10), 48  }
  0x17   : > { %s962_s26 = smov (!%p196_p10), 104  }
  0x18   : > { %s234_s13 = scalar_select %p233_p11, %s940_s18, 1 }
  0x1a   : > { %s628_s14 = sshll.u32 %s234_s13, 3  ;;  %s959_s13 = smov 56  }
  0x1b   : > { %712 = vmatpush3.bf16.xpose.msk.msra.mxu0 %vm1061_vm1, %v710_v8  ;;  %s239_s29 = scalar_lea.vmem %s1286_s0, %s628_s14  ;;  %s960_s14 = smov 112  }
  0x1c   : > { %713 = vmatprep.subr.bf16.mxu0 %v950_v2  ;;  %v240_v21 = vld [vmem:[%s239_s29] sm:$0xff]  ;;  %s963_s29 = smov 40  }
  0x23   : > { %716 = vmatpush3.bf16.xpose.msk.msra.mxu0 %vm1061_vm1, %v714_v11 }
  0x24   : > { %717 = vmatprep.subr.bf16.mxu0 %v950_v2 }
  0x2b   : > { %720 = vmatpush3.bf16.xpose.msk.msra.mxu0 %vm1061_vm1, %v718_v14 }
  0x2c   : > { %721 = vmatprep.subr.bf16.mxu0 %v950_v2 }
  0x33   : > { %724 = vmatpush3.bf16.xpose.msk.msra.mxu0 %vm1061_vm1, %v722_v17 }
  0x34   : > { %725 = vmatprep.subr.bf16.mxu0 %v950_v2 }
  0x3b   : > { %728 = vmatpush3.bf16.xpose.msk.msra.mxu0 %vm1061_vm1, %v726_v20 }
  0x42   : > { %703 = vmatmul.mubr.msk.f32.vlgmr.msra.gmra.mrb[0].mxu0 %vm253_vm0, %v240_v21 }
 0x115   : > { %v359_v22 = vpop.f32.mrb[0].mxu0 }
 0x116   : > { %396 = vrot.lane.b32.xlu1 %v359_v22, %s953_s6  ;;  %367 = vrot.lane.b32.xlu0 %v359_v22, %s954_s7  ;;  %v704_v23 = vpop.f32.mrb[1].mxu0  ;;  %v363_v24 = vmul.f32 0.35355338, %v359_v22  ;;  %s225_s6 = scalar_lea.vmem [#allocation4], %s1116_s5 }
 0x117   : > { %s463_s7 = sshll.u32 %s225_s6, 4  ;;  %s1132_s7 = int_to_ptr.vmem [resolvable:$true] %s463_s7 }
 0x118   : > { %365 = vst.msk [vmem:[%s1119_s8] sm:$0xff] %vm364_vm3, %v363_v24 }
 0x11a   : > { %411 = vrot.lane.b32.xlu1 %v359_v22, %s955_s9  ;;  %381 = vrot.lane.b32.xlu0 %v359_v22, %s956_s10  ;;  %s1126_s9 = sand.u32 1, %s620_s21   ;;  %s1129_s10 = sshll.u32 %s940_s18, 9 }
 0x11b   : > { %s1139_s21 = scalar_lea.hbm %s1289_s3, %s1129_s10  ;;  %s1292_s18 = scalar_lea.sflag [#allocation5], %s1126_s9 }
 0x11e   : > { %371 = vrot.lane.b32.xlu0 %v359_v22, %s957_s11  ;;  %376 = vrot.lane.b32.xlu1 %v363_v24, %s958_s12 }
 0x122   : > { %386 = vrot.lane.b32.xlu0 %v359_v22, %s959_s13  ;;  %391 = vrot.lane.b32.xlu1 %v363_v24, %s960_s14  ;;  %s810_s13 = scalar_lea.vmem %s1132_s7, 512  ;;  %s964_s14 = smov [#allocation4]  }
 0x123   : > { %p811_p12 = scmp.ne.s32.totalorder %s1132_s7, %s810_s13 }
 0x125   : > { %p812_p13 = pnand %p811_p12, %p1036_p4 }
 0x126   : > { %401 = vrot.lane.b32.xlu0 %v359_v22, %s961_s24  ;;  %406 = vrot.lane.b32.xlu1 %v363_v24, %s962_s26  ;;  %s814_s24 = sshll.u32 %s964_s14, 4  ;;  %s815_s24 = int_to_ptr.vmem [resolvable:$false] %s814_s24 }
 0x127   : > { %p813_p0 = pneg %p812_p13  ;;  %s816_s26 = scalar_lea.vmem %s815_s24, 1024 }
 0x128   : > { %p817_p1 = scmp.lt.s32.totalorder %s1132_s7, %s815_s24  ;;  %p818_p2 = scmp.lt.s32.totalorder %s816_s26, %s810_s13 }
 0x12a   : > { %416 = vrot.lane.b32.xlu0 %v359_v22, %s963_s29  ;;  %p819_p3 = por %p818_p2, %p817_p1 }
 0x12c   : > { %p820_p5 = pnand %p819_p3, %p813_p0 }
 0x188   : > { %v397_v25 = vpop.permute.xlu1 %396  ;;  %v368_v26 = vpop.permute.xlu0 %367 }
 0x189   : > { %646 = vst.msk [vmem:[%s225_s6 + $0x10] sm:$0xff] %vm364_vm3, %v397_v25  ;;  %370 = vst.msk [vmem:[%s225_s6] sm:$0xff] %vm364_vm3, %v368_v26 }
 0x18c   : > { %v412_v27 = vpop.permute.xlu1 %411  ;;  %v382_v28 = vpop.permute.xlu0 %381 }
 0x18d   : > { %649 = vst.msk [vmem:[%s225_s6 + $0x18] sm:$0xff] %vm364_vm3, %v412_v27  ;;  %643 = vst.msk [vmem:[%s225_s6 + $0x8] sm:$0xff] %vm364_vm3, %v382_v28 }
 0x18e   : > { %823 = shalt.err (!%p820_p5)
}
 0x18f   : > { %s824_s29 = scalar_lea.hbm %s1139_s21, 512  ;;  %s828_s12 = scalar_lea.hbm %s1289_s3, 1024 }
 0x190   : > { %p825_p6 = scmp.ne.s32.totalorder %s1139_s21, %s824_s29  ;;  %p829_p10 = scmp.lt.u32.totalorder %s1139_s21, %s1289_s3 }
 0x191   : > { %p830_p11 = scmp.lt.u32.totalorder %s828_s12, %s824_s29  ;;  %p832_p13 = scmp.lt.u32.totalorder %s824_s29, %s1139_s21 }
 0x192   : > { %p826_p7 = pnand %p825_p6, %p1036_p4 }
 0x193   : > { %p831_p12 = por %p830_p11, %p829_p10 }
 0x194   : > { %p827_p9 = pneg %p826_p7 }
 0x195   : > { %p833_p0 = por %p832_p13, %p831_p12 }
 0x197   : > { %p834_p1 = pnand %p833_p0, %p827_p9 }
 0x199   : > { %837 = shalt.err (!%p834_p1)
}
 0x19a   : > { %s965_s13 = smov 128   ;;  %s966_s26 = smov 8   ;;  %v372_v29 = vpop.permute.xlu0 %371  ;;  %v377_v30 = vpop.permute.xlu1 %376 }
 0x19b   : > { %730 = dma.vmem_to_hbm [thread:$0]  (%p1036_p4), %s1132_s7, 512, %s1139_s21, %s1292_s18, %s965_s13, %s965_s13, %s966_s26  }
 0x19c   : > { %s1171_s29 = scalar_lea.vmem [#allocation6], %s1116_s5  ;;  %642 = vst.msk [vmem:[%s1119_s8 + $0x8] sm:$0xff] %vm364_vm3, %v377_v30  ;;  %s446_s6 = sshll.u32 %s1119_s8, 4  ;;  %s1182_s6 = int_to_ptr.vmem [resolvable:$true] %s446_s6 }
 0x19d   : > { %374 = vst.msk [vmem:[%s1171_s29] sm:$0xff] %vm364_vm3, %v372_v29  ;;  %s1188_s21 = scalar_lea.hbm %s1288_s2, %s1129_s10  ;;  %s480_s11 = sshll.u32 %s1171_s29, 4  ;;  %s1226_s11 = int_to_ptr.vmem [resolvable:$true] %s480_s11 }
 0x19e   : > { %v387_v31 = vpop.permute.xlu0 %386  ;;  %v392_v32 = vpop.permute.xlu1 %391  ;;  %s1197_s12 = scalar_lea.sflag [#allocation3], %s216_s30  ;;  %s838_s14 = scalar_lea.vmem %s1182_s6, 512 }
 0x19f   : > { %644 = vst.msk [vmem:[%s1171_s29 + $0x8] sm:$0xff] %vm364_vm3, %v387_v31  ;;  %645 = vst.msk [vmem:[%s1119_s8 + $0x10] sm:$0xff] %vm364_vm3, %v392_v32  ;;  %p839_p2 = scmp.ne.s32.totalorder %s1182_s6, %s838_s14  ;;  %s967_s24 = smov [#allocation2]  }
 0x1a0   : > { %s842_s5 = sshll.u32 %s967_s24, 4  ;;  %s843_s5 = int_to_ptr.vmem [resolvable:$false] %s842_s5 }
 0x1a1   : > { %p840_p3 = pnand %p839_p2, %p1036_p4  ;;  %s844_s7 = scalar_lea.vmem %s843_s5, 1024 }
 0x1a2   : > { %v402_v33 = vpop.permute.xlu0 %401  ;;  %v407_v34 = vpop.permute.xlu1 %406  ;;  %p845_p6 = scmp.lt.s32.totalorder %s1182_s6, %s843_s5  ;;  %p846_p7 = scmp.lt.s32.totalorder %s844_s7, %s838_s14 }
 0x1a3   : > { %647 = vst.msk [vmem:[%s1171_s29 + $0x10] sm:$0xff] %vm364_vm3, %v402_v33  ;;  %648 = vst.msk [vmem:[%s1119_s8 + $0x18] sm:$0xff] %vm364_vm3, %v407_v34  ;;  %p841_p5 = pneg %p840_p3 }
 0x1a4   : > { %p847_p9 = por %p846_p7, %p845_p6 }
 0x1a6   : > { %p848_p10 = pnand %p847_p9, %p841_p5 }
 0x1a8   : > { %851 = shalt.err (!%p848_p10)
}
 0x1a9   : > { %s852_s30 = scalar_lea.hbm %s1188_s21, 512  ;;  %s856_s24 = scalar_lea.hbm %s1288_s2, 1024 }
 0x1aa   : > { %p853_p11 = scmp.ne.s32.totalorder %s1188_s21, %s852_s30  ;;  %p857_p0 = scmp.lt.u32.totalorder %s1188_s21, %s1288_s2 }
 0x1ab   : > { %p858_p1 = scmp.lt.u32.totalorder %s856_s24, %s852_s30  ;;  %p860_p3 = scmp.lt.u32.totalorder %s852_s30, %s1188_s21 }
 0x1ac   : > { %p854_p12 = pnand %p853_p11, %p1036_p4 }
 0x1ad   : > { %p859_p2 = por %p858_p1, %p857_p0 }
 0x1ae   : > { %p855_p13 = pneg %p854_p12 }
 0x1af   : > { %p861_p5 = por %p860_p3, %p859_p2 }
 0x1b1   : > { %p862_p6 = pnand %p861_p5, %p855_p13 }
 0x1b3   : > { %865 = shalt.err (!%p862_p6)
}
 0x1b4   : > { %729 = dma.vmem_to_hbm [thread:$0]  (%p1036_p4), %s1182_s6, 512, %s1188_s21, %s1197_s12, %s965_s13, %s965_s13, %s966_s26   ;;  %v417_v35 = vpop.permute.xlu0 %416 }
 0x1b5   : > { %s1232_s14 = scalar_lea.hbm %s1290_s4, %s1129_s10  ;;  %650 = vst.msk [vmem:[%s1171_s29 + $0x18] sm:$0xff] %vm364_vm3, %v417_v35  ;;  %s866_s7 = scalar_lea.vmem %s1226_s11, 512 }
 0x1b6   : > { %p867_p7 = scmp.ne.s32.totalorder %s1226_s11, %s866_s7  ;;  %s968_s6 = smov [#allocation6]  }
 0x1b7   : > { %s870_s21 = sshll.u32 %s968_s6, 4  ;;  %s871_s21 = int_to_ptr.vmem [resolvable:$false] %s870_s21 }
 0x1b8   : > { %p868_p9 = pnand %p867_p7, %p1036_p4  ;;  %s872_s12 = scalar_lea.vmem %s871_s21, 1024 }
 0x1b9   : > { %p873_p11 = scmp.lt.s32.totalorder %s1226_s11, %s871_s21  ;;  %p874_p12 = scmp.lt.s32.totalorder %s872_s12, %s866_s7 }
 0x1ba   : > { %p869_p10 = pneg %p868_p9 }
 0x1bb   : > { %p875_p13 = por %p874_p12, %p873_p11 }
 0x1bd   : > { %p876_p0 = pnand %p875_p13, %p869_p10 }
 0x1bf   : > { %879 = shalt.err (!%p876_p0)
}
 0x1c0   : > { %s880_s10 = scalar_lea.hbm %s1232_s14, 512  ;;  %s884_s8 = scalar_lea.hbm %s1290_s4, 1024 }
 0x1c1   : > { %p881_p1 = scmp.ne.s32.totalorder %s1232_s14, %s880_s10  ;;  %p885_p5 = scmp.lt.u32.totalorder %s1232_s14, %s1290_s4 }
 0x1c2   : > { %p886_p6 = scmp.lt.u32.totalorder %s884_s8, %s880_s10  ;;  %p888_p9 = scmp.lt.u32.totalorder %s880_s10, %s1232_s14 }
 0x1c3   : > { %p882_p2 = pnand %p881_p1, %p1036_p4 }
 0x1c4   : > { %p887_p7 = por %p886_p6, %p885_p5 }
 0x1c5   : > { %p883_p3 = pneg %p882_p2 }
 0x1c6   : > { %p889_p10 = por %p888_p9, %p887_p7 }
 0x1c8   : > { %p890_p11 = pnand %p889_p10, %p883_p3 }
 0x1ca   : > { %893 = shalt.err (!%p890_p11)
}
 0x1cb   : > { %s1297_s22 = scalar_lea.sflag [#allocation5], %s1126_s9 }
 0x1cc   : > { %731 = dma.vmem_to_hbm [thread:$0]  (%p1036_p4), %s1226_s11, 512, %s1232_s14, %s1297_s22, %s965_s13, %s965_s13, %s966_s26  }
 0x1cd PF: > { %p745_p12 = scmp.ge.s32.totalorder %s948_s20, 2  ;;  %s495_s18 = sand.u32 1, %s928_s15  }
 0x1ce   : > { %s496_s7 = scalar_lea.sflag [#allocation3], %s495_s18 }
 0x1cf   : > { %p736_p13 = pnand %p745_p12, %p1045_p8 }
 0x1d1   : > { %919 = dma.done.wait (!%p736_p13), %s496_s7, 512  }
 0x1d2   : > { %921 = vsyncadd (!%p736_p13), %s496_s7, 4294966784  ;;  %s1298_s25 = sadd.s32 4294967294, %s948_s20  }
 0x1d3   : > { %s504_s6 = sand.u32 1, %s1298_s25  }
 0x1d4   : > { %s505_s21 = scalar_lea.sflag [#allocation5], %s504_s6 }
 0x1d5   : > { %923 = dma.done.wait (!%p736_p13), %s505_s21, 1024  }
 0x1d6   : > { %925 = vsyncadd (!%p736_p13), %s505_s21, 4294966272  ;;  %s21_s20 = sadd.s32 1, %s948_s20   ;;  %s1299_s15 = smov %s932_s16 }
 0x1d7   : > { %p18_p4 = scmp.ge.s32.totalorder %s21_s20, 4   ;;  %s1300_s16 = smov %s936_s17 }
 0x1d8   : > { %s1301_s17 = smov %s1051_s28  ;;  %s1302_s18 = smov %s944_s19 }
 0x1d9   : > { %s1303_s19 = smov %s1305_s23  ;;  %20 = sbr.rel (!%p18_p4) target bundleno = 6 (0x6), region = 104 }
 0x1e0   :  { %519 = vsyncpa [#allocation3], 1 }
 0x1e1   :  { %521 = vsyncpa [#allocation3 + $0x1], 1 }
 0x1e2   :  { %522 = vsyncpa [#allocation5], 1 }
 0x1e3   :  { %524 = vsyncpa [#allocation5 + $0x1], 1 }

// kernel: tpu_custom_call.1
= control target key start
LH: loop header
LB: loop body
LE: loop exit
PB: predicated region body
PF: predicated region fallthrough
CT: control target
= control target key end

     0   :  { %10 = vsyncpa [#allocation3], 0  ;;  %s1286_s0 = inlined_call_operand.vmem [shape: f32[2,8,32], index: 0, kind: input, shape index: {}]   ;;  %s1287_s1 = inlined_call_operand.vmem [shape: f32[96,32], index: 1, kind: input, shape index: {}]   ;;  %s1288_s2 = inlined_call_operand.hbm [shape: f32[2,4,8,8], index: 2, kind: output, shape index: {0}]   ;;  %s1289_s3 = inlined_call_operand.hbm [shape: f32[2,4,8,8], index: 3, kind: output, shape index: {1}]   ;;  %s1290_s4 = inlined_call_operand.hbm [shape: f32[2,4,8,8], index: 4, kind: output, shape index: {2}]  }
   0x1   :  { %12 = vsyncpa [#allocation3 + $0x1], 0 }
   0x2   :  { %13 = vsyncpa [#allocation5], 0 }
   0x3   :  { %15 = vsyncpa [#allocation5 + $0x1], 0  ;;  %s994_s15 = smov 0   ;;  %s996_s16 = smov 0  }
   0x4   :  { %s998_s17 = smov 0   ;;  %s1000_s18 = smov 0  }
   0x5   :  { %s1002_s19 = smov 0   ;;  %s1004_s20 = smov 0  }
   0x6 LB: > { %s620_s21 = sadd.s32 4294967295, %s948_s20   ;;  %s1291_s22 = sadd.s32 4294967294, %s948_s20   ;;  %s948_s20 = sphi %s1004_s20, %s21_s20   ;;  %s944_s19 = sphi %s1002_s19, %s1303_s19   ;;  %s940_s18 = sphi %s1000_s18, %s1302_s18   ;;  %s936_s17 = sphi %s998_s17, %s1301_s17   ;;  %s932_s16 = sphi %s996_s16, %s1300_s16   ;;  %s928_s15 = sphi %s994_s15, %s1299_s15  }
   0x7   : > { %s33_s23 = sadd.s32 1, %s944_s19  ;;  %s91_s24 = sadd.s32 1, %s936_s17 }
   0x8   : > { %p35_p0 = scmp.ge.s32.totalorder %s33_s23, 2  ;;  %p101_p1 = scmp.ne.s32.totalorder %s936_s17, %s932_s16 }
   0x9   : > { %p102_p2 = scmp.eq.s32.totalorder %s620_s21, 1  ;;  %p107_p3 = scmp.ne.s32.totalorder %s932_s16, %s928_s15 }
   0xa   : > { %s1305_s23 = smov (%p35_p0, %s33_s23), 0  ;;  %p108_p5 = scmp.eq.s32.totalorder %s1291_s22, 1 }
   0xb   : > { %p1036_p4 = por %p102_p2, %p101_p1  ;;  %s86_s26 = ssub.s32 %s944_s19, %s1305_s23 }
   0xc   : > { %p624_p6 = scmp.ge.s32.totalorder %s948_s20, 1  ;;  %p89_p7 = scmp.eq.s32.totalorder %s86_s26, 0 }
   0xd   : > { %p1045_p8 = por %p108_p5, %p107_p3  ;;  %p195_p9 = scmp.lt.s32.totalorder %s948_s20, 3 }
   0xe   : > { %s1051_s28 = scalar_select %p89_p7, %s936_s17, %s91_s24  }
   0xf   : > { %p196_p10 = pnand %p624_p6, %p195_p9 }
  0x10   : > { %v241_v0 = vld [vmem:[%s1287_s1] sm:$0xff] (!%p196_p10)  ;;  %v242_v1 = vld [vmem:[%s1287_s1 + $0x8] sm:$0xff] (!%p196_p10)  ;;  %vm253_vm0 = vcmask (!%p196_p10), 261120   ;;  %v950_v2 = vmov (!%p196_p10), 0.0|0.0   ;;  %vm951_vm2 = vmmov (!%p196_p10), 0   ;;  %v952_v5 = vmov (!%p196_p10), 0.0  }
  0x11   : > { %199 = sbr.rel (%p196_p10) target bundleno = 461 (0x1cd), region = 28  ;;  %705 = vmatprep.subr.bf16.mxu0 (!%p196_p10), %v950_v2  ;;  %v706_v3 = vpack.c.bf16 (!%p196_p10), %v242_v1, %v241_v0  ;;  %vm1061_vm1 = vmpackc.low (!%p196_p10), %vm253_vm0, %vm253_vm0  ;;  %702 = vmatprep.mubr.msk.f32.mxu0 (!%p196_p10), %vm951_vm2, %v952_v5  ;;  %v243_v6 = vld [vmem:[%s1287_s1 + $0x10] sm:$0xff] (!%p196_p10)  ;;  %v244_v7 = vld [vmem:[%s1287_s1 + $0x18] sm:$0xff] (!%p196_p10)  ;;  %p233_p11 = scmp.lt.s32.totalorder (!%p196_p10), %s940_s18, 1  ;;  %vm364_vm3 = vcmask (!%p196_p10), 64512  }
  0x12   : > { %v710_v8 = vpack.c.bf16 (!%p196_p10), %v244_v7, %v243_v6  ;;  %v245_v9 = vld [vmem:[%s1287_s1 + $0x20] sm:$0xff] (!%p196_p10)  ;;  %v246_v10 = vld [vmem:[%s1287_s1 + $0x28] sm:$0xff] (!%p196_p10)  ;;  %v247_v12 = vld [vmem:[%s1287_s1 + $0x30] sm:$0xff] (!%p196_p10)  ;;  %s216_s30 = sand.u32 (!%p196_p10), 1, %s932_s16   ;;  %s953_s6 = smov (!%p196_p10), 80  }
  0x13   : > { %708 = vmatpush3.bf16.xpose.msk.msra.mxu0 (!%p196_p10), %vm1061_vm1, %v706_v3  ;;  %v714_v11 = vpack.c.bf16 (!%p196_p10), %v246_v10, %v245_v9  ;;  %v248_v13 = vld [vmem:[%s1287_s1 + $0x38] sm:$0xff] (!%p196_p10)  ;;  %v249_v15 = vld [vmem:[%s1287_s1 + $0x40] sm:$0xff] (!%p196_p10)  ;;  %v250_v16 = vld [vmem:[%s1287_s1 + $0x48] sm:$0xff] (!%p196_p10)  ;;  %s1116_s5 = sshll.u32 (!%p196_p10), %s216_s30, 5  ;;  %s954_s7 = smov (!%p196_p10), 96  }
  0x14   : > { %709 = vmatprep.subr.bf16.mxu0 (!%p196_p10), %v950_v2  ;;  %v718_v14 = vpack.c.bf16 (!%p196_p10), %v248_v13, %v247_v12  ;;  %v722_v17 = vpack.c.bf16 (!%p196_p10), %v250_v16, %v249_v15  ;;  %v251_v18 = vld [vmem:[%s1287_s1 + $0x50] sm:$0xff] (!%p196_p10)  ;;  %v252_v19 = vld [vmem:[%s1287_s1 + $0x58] sm:$0xff] (!%p196_p10)  ;;  %s1119_s8 = scalar_lea.vmem (!%p196_p10), [#allocation2], %s1116_s5  ;;  %s955_s9 = smov (!%p196_p10), 72  }
  0x15   : > { %v726_v20 = vpack.c.bf16 (!%p196_p10), %v252_v19, %v251_v18  ;;  %s956_s10 = smov (!%p196_p10), 88   ;;  %s957_s11 = smov (!%p196_p10), 64  }
  0x16   : > { %s958_s12 = smov (!%p196_p10), 120   ;;  %s961_s24 = smov (!%p196_p10), 48  }
  0x17   : > { %s962_s26 = smov (!%p196_p10), 104  }
  0x18   : > { %s234_s13 = scalar_select %p233_p11, %s940_s18, 1 }
  0x1a   : > { %s628_s14 = sshll.u32 %s234_s13, 3  ;;  %s959_s13 = smov 56  }
  0x1b   : > { %712 = vmatpush3.bf16.xpose.msk.msra.mxu0 %vm1061_vm1, %v710_v8  ;;  %s239_s29 = scalar_lea.vmem %s1286_s0, %s628_s14  ;;  %s960_s14 = smov 112  }
  0x1c   : > { %713 = vmatprep.subr.bf16.mxu0 %v950_v2  ;;  %v240_v21 = vld [vmem:[%s239_s29] sm:$0xff]  ;;  %s963_s29 = smov 40  }
  0x23   : > { %716 = vmatpush3.bf16.xpose.msk.msra.mxu0 %vm1061_vm1, %v714_v11 }
  0x24   : > { %717 = vmatprep.subr.bf16.mxu0 %v950_v2 }
  0x2b   : > { %720 = vmatpush3.bf16.xpose.msk.msra.mxu0 %vm1061_vm1, %v718_v14 }
  0x2c   : > { %721 = vmatprep.subr.bf16.mxu0 %v950_v2 }
  0x33   : > { %724 = vmatpush3.bf16.xpose.msk.msra.mxu0 %vm1061_vm1, %v722_v17 }
  0x34   : > { %725 = vmatprep.subr.bf16.mxu0 %v950_v2 }
  0x3b   : > { %728 = vmatpush3.bf16.xpose.msk.msra.mxu0 %vm1061_vm1, %v726_v20 }
  0x42   : > { %703 = vmatmul.mubr.msk.f32.vlgmr.msra.gmra.mrb[0].mxu0 %vm253_vm0, %v240_v21 }
 0x115   : > { %v359_v22 = vpop.f32.mrb[0].mxu0 }
 0x116   : > { %396 = vrot.lane.b32.xlu1 %v359_v22, %s953_s6  ;;  %367 = vrot.lane.b32.xlu0 %v359_v22, %s954_s7  ;;  %v704_v23 = vpop.f32.mrb[1].mxu0  ;;  %v363_v24 = vmul.f32 0.35355338, %v359_v22  ;;  %s225_s6 = scalar_lea.vmem [#allocation4], %s1116_s5 }
 0x117   : > { %s463_s7 = sshll.u32 %s225_s6, 4  ;;  %s1132_s7 = int_to_ptr.vmem [resolvable:$true] %s463_s7 }
 0x118   : > { %365 = vst.msk [vmem:[%s1119_s8] sm:$0xff] %vm364_vm3, %v363_v24 }
 0x11a   : > { %411 = vrot.lane.b32.xlu1 %v359_v22, %s955_s9  ;;  %381 = vrot.lane.b32.xlu0 %v359_v22, %s956_s10  ;;  %s1126_s9 = sand.u32 1, %s620_s21   ;;  %s1129_s10 = sshll.u32 %s940_s18, 9 }
 0x11b   : > { %s1139_s21 = scalar_lea.hbm %s1289_s3, %s1129_s10  ;;  %s1292_s18 = scalar_lea.sflag [#allocation5], %s1126_s9 }
 0x11e   : > { %371 = vrot.lane.b32.xlu0 %v359_v22, %s957_s11  ;;  %376 = vrot.lane.b32.xlu1 %v363_v24, %s958_s12 }
 0x122   : > { %386 = vrot.lane.b32.xlu0 %v359_v22, %s959_s13  ;;  %391 = vrot.lane.b32.xlu1 %v363_v24, %s960_s14  ;;  %s810_s13 = scalar_lea.vmem %s1132_s7, 512  ;;  %s964_s14 = smov [#allocation4]  }
 0x123   : > { %p811_p12 = scmp.ne.s32.totalorder %s1132_s7, %s810_s13 }
 0x125   : > { %p812_p13 = pnand %p811_p12, %p1036_p4 }
 0x126   : > { %401 = vrot.lane.b32.xlu0 %v359_v22, %s961_s24  ;;  %406 = vrot.lane.b32.xlu1 %v363_v24, %s962_s26  ;;  %s814_s24 = sshll.u32 %s964_s14, 4  ;;  %s815_s24 = int_to_ptr.vmem [resolvable:$false] %s814_s24 }
 0x127   : > { %p813_p0 = pneg %p812_p13  ;;  %s816_s26 = scalar_lea.vmem %s815_s24, 1024 }
 0x128   : > { %p817_p1 = scmp.lt.s32.totalorder %s1132_s7, %s815_s24  ;;  %p818_p2 = scmp.lt.s32.totalorder %s816_s26, %s810_s13 }
 0x12a   : > { %416 = vrot.lane.b32.xlu0 %v359_v22, %s963_s29  ;;  %p819_p3 = por %p818_p2, %p817_p1 }
 0x12c   : > { %p820_p5 = pnand %p819_p3, %p813_p0 }
 0x188   : > { %v397_v25 = vpop.permute.xlu1 %396  ;;  %v368_v26 = vpop.permute.xlu0 %367 }
 0x189   : > { %646 = vst.msk [vmem:[%s225_s6 + $0x10] sm:$0xff] %vm364_vm3, %v397_v25  ;;  %370 = vst.msk [vmem:[%s225_s6] sm:$0xff] %vm364_vm3, %v368_v26 }
 0x18c   : > { %v412_v27 = vpop.permute.xlu1 %411  ;;  %v382_v28 = vpop.permute.xlu0 %381 }
 0x18d   : > { %649 = vst.msk [vmem:[%s225_s6 + $0x18] sm:$0xff] %vm364_vm3, %v412_v27  ;;  %643 = vst.msk [vmem:[%s225_s6 + $0x8] sm:$0xff] %vm364_vm3, %v382_v28 }
 0x18e   : > { %823 = shalt.err (!%p820_p5)
}
 0x18f   : > { %s824_s29 = scalar_lea.hbm %s1139_s21, 512  ;;  %s828_s12 = scalar_lea.hbm %s1289_s3, 1024 }
 0x190   : > { %p825_p6 = scmp.ne.s32.totalorder %s1139_s21, %s824_s29  ;;  %p829_p10 = scmp.lt.u32.totalorder %s1139_s21, %s1289_s3 }
 0x191   : > { %p830_p11 = scmp.lt.u32.totalorder %s828_s12, %s824_s29  ;;  %p832_p13 = scmp.lt.u32.totalorder %s824_s29, %s1139_s21 }
 0x192   : > { %p826_p7 = pnand %p825_p6, %p1036_p4 }
 0x193   : > { %p831_p12 = por %p830_p11, %p829_p10 }
 0x194   : > { %p827_p9 = pneg %p826_p7 }
 0x195   : > { %p833_p0 = por %p832_p13, %p831_p12 }
 0x197   : > { %p834_p1 = pnand %p833_p0, %p827_p9 }
 0x199   : > { %837 = shalt.err (!%p834_p1)
}
 0x19a   : > { %s965_s13 = smov 128   ;;  %s966_s26 = smov 8   ;;  %v372_v29 = vpop.permute.xlu0 %371  ;;  %v377_v30 = vpop.permute.xlu1 %376 }
 0x19b   : > { %730 = dma.vmem_to_hbm [thread:$0]  (%p1036_p4), %s1132_s7, 512, %s1139_s21, %s1292_s18, %s965_s13, %s965_s13, %s966_s26  }
 0x19c   : > { %s1171_s29 = scalar_lea.vmem [#allocation6], %s1116_s5  ;;  %642 = vst.msk [vmem:[%s1119_s8 + $0x8] sm:$0xff] %vm364_vm3, %v377_v30  ;;  %s446_s6 = sshll.u32 %s1119_s8, 4  ;;  %s1182_s6 = int_to_ptr.vmem [resolvable:$true] %s446_s6 }
 0x19d   : > { %374 = vst.msk [vmem:[%s1171_s29] sm:$0xff] %vm364_vm3, %v372_v29  ;;  %s1188_s21 = scalar_lea.hbm %s1288_s2, %s1129_s10  ;;  %s480_s11 = sshll.u32 %s1171_s29, 4  ;;  %s1226_s11 = int_to_ptr.vmem [resolvable:$true] %s480_s11 }
 0x19e   : > { %v387_v31 = vpop.permute.xlu0 %386  ;;  %v392_v32 = vpop.permute.xlu1 %391  ;;  %s1197_s12 = scalar_lea.sflag [#allocation3], %s216_s30  ;;  %s838_s14 = scalar_lea.vmem %s1182_s6, 512 }
 0x19f   : > { %644 = vst.msk [vmem:[%s1171_s29 + $0x8] sm:$0xff] %vm364_vm3, %v387_v31  ;;  %645 = vst.msk [vmem:[%s1119_s8 + $0x10] sm:$0xff] %vm364_vm3, %v392_v32  ;;  %p839_p2 = scmp.ne.s32.totalorder %s1182_s6, %s838_s14  ;;  %s967_s24 = smov [#allocation2]  }
 0x1a0   : > { %s842_s5 = sshll.u32 %s967_s24, 4  ;;  %s843_s5 = int_to_ptr.vmem [resolvable:$false] %s842_s5 }
 0x1a1   : > { %p840_p3 = pnand %p839_p2, %p1036_p4  ;;  %s844_s7 = scalar_lea.vmem %s843_s5, 1024 }
 0x1a2   : > { %v402_v33 = vpop.permute.xlu0 %401  ;;  %v407_v34 = vpop.permute.xlu1 %406  ;;  %p845_p6 = scmp.lt.s32.totalorder %s1182_s6, %s843_s5  ;;  %p846_p7 = scmp.lt.s32.totalorder %s844_s7, %s838_s14 }
 0x1a3   : > { %647 = vst.msk [vmem:[%s1171_s29 + $0x10] sm:$0xff] %vm364_vm3, %v402_v33  ;;  %648 = vst.msk [vmem:[%s1119_s8 + $0x18] sm:$0xff] %vm364_vm3, %v407_v34  ;;  %p841_p5 = pneg %p840_p3 }
 0x1a4   : > { %p847_p9 = por %p846_p7, %p845_p6 }
 0x1a6   : > { %p848_p10 = pnand %p847_p9, %p841_p5 }
 0x1a8   : > { %851 = shalt.err (!%p848_p10)
}
 0x1a9   : > { %s852_s30 = scalar_lea.hbm %s1188_s21, 512  ;;  %s856_s24 = scalar_lea.hbm %s1288_s2, 1024 }
 0x1aa   : > { %p853_p11 = scmp.ne.s32.totalorder %s1188_s21, %s852_s30  ;;  %p857_p0 = scmp.lt.u32.totalorder %s1188_s21, %s1288_s2 }
 0x1ab   : > { %p858_p1 = scmp.lt.u32.totalorder %s856_s24, %s852_s30  ;;  %p860_p3 = scmp.lt.u32.totalorder %s852_s30, %s1188_s21 }
 0x1ac   : > { %p854_p12 = pnand %p853_p11, %p1036_p4 }
 0x1ad   : > { %p859_p2 = por %p858_p1, %p857_p0 }
 0x1ae   : > { %p855_p13 = pneg %p854_p12 }
 0x1af   : > { %p861_p5 = por %p860_p3, %p859_p2 }
 0x1b1   : > { %p862_p6 = pnand %p861_p5, %p855_p13 }
 0x1b3   : > { %865 = shalt.err (!%p862_p6)
}
 0x1b4   : > { %729 = dma.vmem_to_hbm [thread:$0]  (%p1036_p4), %s1182_s6, 512, %s1188_s21, %s1197_s12, %s965_s13, %s965_s13, %s966_s26   ;;  %v417_v35 = vpop.permute.xlu0 %416 }
 0x1b5   : > { %s1232_s14 = scalar_lea.hbm %s1290_s4, %s1129_s10  ;;  %650 = vst.msk [vmem:[%s1171_s29 + $0x18] sm:$0xff] %vm364_vm3, %v417_v35  ;;  %s866_s7 = scalar_lea.vmem %s1226_s11, 512 }
 0x1b6   : > { %p867_p7 = scmp.ne.s32.totalorder %s1226_s11, %s866_s7  ;;  %s968_s6 = smov [#allocation6]  }
 0x1b7   : > { %s870_s21 = sshll.u32 %s968_s6, 4  ;;  %s871_s21 = int_to_ptr.vmem [resolvable:$false] %s870_s21 }
 0x1b8   : > { %p868_p9 = pnand %p867_p7, %p1036_p4  ;;  %s872_s12 = scalar_lea.vmem %s871_s21, 1024 }
 0x1b9   : > { %p873_p11 = scmp.lt.s32.totalorder %s1226_s11, %s871_s21  ;;  %p874_p12 = scmp.lt.s32.totalorder %s872_s12, %s866_s7 }
 0x1ba   : > { %p869_p10 = pneg %p868_p9 }
 0x1bb   : > { %p875_p13 = por %p874_p12, %p873_p11 }
 0x1bd   : > { %p876_p0 = pnand %p875_p13, %p869_p10 }
 0x1bf   : > { %879 = shalt.err (!%p876_p0)
}
 0x1c0   : > { %s880_s10 = scalar_lea.hbm %s1232_s14, 512  ;;  %s884_s8 = scalar_lea.hbm %s1290_s4, 1024 }
 0x1c1   : > { %p881_p1 = scmp.ne.s32.totalorder %s1232_s14, %s880_s10  ;;  %p885_p5 = scmp.lt.u32.totalorder %s1232_s14, %s1290_s4 }
 0x1c2   : > { %p886_p6 = scmp.lt.u32.totalorder %s884_s8, %s880_s10  ;;  %p888_p9 = scmp.lt.u32.totalorder %s880_s10, %s1232_s14 }
 0x1c3   : > { %p882_p2 = pnand %p881_p1, %p1036_p4 }
 0x1c4   : > { %p887_p7 = por %p886_p6, %p885_p5 }
 0x1c5   : > { %p883_p3 = pneg %p882_p2 }
 0x1c6   : > { %p889_p10 = por %p888_p9, %p887_p7 }
 0x1c8   : > { %p890_p11 = pnand %p889_p10, %p883_p3 }
 0x1ca   : > { %893 = shalt.err (!%p890_p11)
}
 0x1cb   : > { %s1297_s22 = scalar_lea.sflag [#allocation5], %s1126_s9 }
 0x1cc   : > { %731 = dma.vmem_to_hbm [thread:$0]  (%p1036_p4), %s1226_s11, 512, %s1232_s14, %s1297_s22, %s965_s13, %s965_s13, %s966_s26  }
 0x1cd PF: > { %p745_p12 = scmp.ge.s32.totalorder %s948_s20, 2  ;;  %s495_s18 = sand.u32 1, %s928_s15  }
 0x1ce   : > { %s496_s7 = scalar_lea.sflag [#allocation3], %s495_s18 }
 0x1cf   : > { %p736_p13 = pnand %p745_p12, %p1045_p8 }
 0x1d1   : > { %919 = dma.done.wait (!%p736_p13), %s496_s7, 512  }
 0x1d2   : > { %921 = vsyncadd (!%p736_p13), %s496_s7, 4294966784  ;;  %s1298_s25 = sadd.s32 4294967294, %s948_s20  }
 0x1d3   : > { %s504_s6 = sand.u32 1, %s1298_s25  }
 0x1d4   : > { %s505_s21 = scalar_lea.sflag [#allocation5], %s504_s6 }
 0x1d5   : > { %923 = dma.done.wait (!%p736_p13), %s505_s21, 1024  }
 0x1d6   : > { %925 = vsyncadd (!%p736_p13), %s505_s21, 4294966272  ;;  %s21_s20 = sadd.s32 1, %s948_s20   ;;  %s1299_s15 = smov %s932_s16 }
 0x1d7   : > { %p18_p4 = scmp.ge.s32.totalorder %s21_s20, 4   ;;  %s1300_s16 = smov %s936_s17 }
 0x1d8   : > { %s1301_s17 = smov %s1051_s28  ;;  %s1302_s18 = smov %s944_s19 }
 0x1d9   : > { %s1303_s19 = smov %s1305_s23  ;;  %20 = sbr.rel (!%p18_p4) target bundleno = 6 (0x6), region = 104 }
 0x1e0   :  { %519 = vsyncpa [#allocation3], 1 }
 0x1e1   :  { %521 = vsyncpa [#allocation3 + $0x1], 1 }
 0x1e2   :  { %522 = vsyncpa [#allocation5], 1 }
 0x1e3   :  { %524 = vsyncpa [#allocation5 + $0x1], 1 }

</bundles_post_ra>
